<compile_context>
chip_gen: v5e
topology: v5e:2x2
jax: 0.10.0
libtpu: 0.0.40
codegen_flags: <defaults>
</compile_context>

<pallas_src>
import jax
import jax.numpy as jnp
from jax import lax
from jax.experimental import pallas as pl
from jax.experimental.pallas import tpu as pltpu

BN_EPS = 1e-5
_VMEM_LIMIT = 32 * 1024 * 1024   # explicit scoped-VMEM limit (safe on v5e/v6e/v7x)
_WS_BUDGET = 16 * 1024 * 1024    # target for the double-buffered tile working set


def _round_up(a, b):
    return (a + b - 1) // b * b


def _stats_kernel(x_ref, colsum_ref, gram_ref):
    """Pass 1: per-channel pixel sums + channel Gram matrix X X^T (global BN stats)."""
    n = pl.program_id(1)
    j = pl.program_id(2)

    @pl.when((n == 0) & (j == 0))
    def _():
        colsum_ref[...] = jnp.zeros_like(colsum_ref)
        gram_ref[...] = jnp.zeros_like(gram_ref)

    xb = x_ref[...]                                           # (Cin, tp), native dtype
    # colsum: cross-lane reduce (XLU slot has slack); accumulate in f32.
    colsum_ref[...] += jnp.sum(xb, axis=1, keepdims=True, dtype=jnp.float32)
    # Gram on the MXU, contracting the pixel/lane axis; native-dtype operands.
    gram_ref[...] += lax.dot_general(
        xb, xb, (((1,), (1,)), ((), ())), preferred_element_type=jnp.float32)


def _conv_bn_kernel(x_ref, w_ref, scale_ref, shift_ref, o_ref):
    """Pass 2: y = W @ x ; o = y * scale + shift (conv + BN folded into one FMA)."""
    y = jnp.dot(w_ref[...], x_ref[...], preferred_element_type=jnp.float32)
    o_ref[...] = (y * scale_ref[...] + shift_ref[...]).astype(o_ref.dtype)


def shortcut(x, conv_w, gamma, beta):
    """ShortCut.forward.

    x:      (N, Cin, H, W)   NCHW, like PyTorch
    conv_w: (Cout, Cin, 1, 1)
    gamma:  (Cout,)  BN weight
    beta:   (Cout,)  BN bias
    """
    N, Cin, H, W = x.shape
    Cout = conv_w.shape[0]

    if Cin == Cout:
        # identity path — no downsample
        return x

    assert Cout == 2 * Cin, "ShortCut requires output_channels == 2 * input_channels"

    # Stride-2 1x1 conv only reads every other pixel -> subsample first, then
    # keep the channel-major (NCHW) layout: only a contiguous reshape, no transposes.
    # TODO(synk): the stride-2 pick itself is still one XLA slice copy; folding it
    # into the Pallas DMA (strided pl.ds over H rows) is possible but lower value.
    xs = x[:, :, ::2, ::2]                                    # (N, Cin, Ho, Wo)
    Ho, Wo = xs.shape[2], xs.shape[3]
    P = Ho * Wo
    M = N * P
    x_flat = xs.reshape(N, Cin, P)                            # native dtype, no up-cast

    itemsize = jnp.dtype(x.dtype).itemsize
    # Double-buffered in+out tiles ~= 2*tp*(Cin+Cout)*itemsize = 6*tp*Cin*itemsize.
    tp = _WS_BUDGET // (6 * Cin * itemsize)
    tp = max(128, min(8192, (tp // 128) * 128))
    tp = min(tp, _round_up(P, 128))

    n_ptiles = pl.cdiv(P, tp)
    n_splits = 2 if n_ptiles >= 2 else 1       # shard pass 1 across v7x's 2 TCs
    n_ptiles = _round_up(n_ptiles, n_splits)
    tiles_per_split = n_ptiles // n_splits
    P_pad = n_ptiles * tp
    if P_pad != P:
        # zero pixels are exact no-ops for colsum / Gram and get sliced off the output
        x_flat = jnp.pad(x_flat, ((0, 0), (0, 0), (0, P_pad - P)))

    w_mat = conv_w[:, :, 0, 0]                                # (Cout, Cin), native dtype

    # ---- pass 1: exact global batch statistics via colsum + Gram matrix ----
    colsum_p, gram_p = pl.pallas_call(
        _stats_kernel,
        out_shape=(
            jax.ShapeDtypeStruct((n_splits, Cin, 1), jnp.float32),
            jax.ShapeDtypeStruct((n_splits, Cin, Cin), jnp.float32),
        ),
        grid=(n_splits, N, tiles_per_split),
        in_specs=[pl.BlockSpec(
            (None, Cin, tp),
            lambda c, n, j: (n, 0, c * tiles_per_split + j))],
        out_specs=(
            pl.BlockSpec((None, Cin, 1), lambda c, n, j: (c, 0, 0)),
            pl.BlockSpec((None, Cin, Cin), lambda c, n, j: (c, 0, 0)),
        ),
        compiler_params=pltpu.CompilerParams(
            dimension_semantics=("parallel", "arbitrary", "arbitrary"),
            vmem_limit_bytes=_VMEM_LIMIT),
    )(x_flat)

    # Tiny per-channel math in XLA glue (all f32, exact global stats).
    colsum = jnp.sum(colsum_p, axis=0)                        # (Cin, 1)
    gram = jnp.sum(gram_p, axis=0)                            # (Cin, Cin)
    wf = w_mat.astype(jnp.float32)
    mean = (wf @ colsum) / M                                  # (Cout, 1)
    ey2 = jnp.sum((wf @ gram) * wf, axis=1, keepdims=True) / M
    # TODO(synk): E[y^2]-mean^2 can lose precision if |mean| >> std at very large M;
    # a per-channel pre-shift of x before forming the Gram would fix it if needed.
    var = jnp.maximum(ey2 - mean * mean, 0.0)                 # biased var (PyTorch train BN)
    scale = gamma.reshape(Cout, 1).astype(jnp.float32) * lax.rsqrt(var + BN_EPS)
    shift = beta.reshape(Cout, 1).astype(jnp.float32) - mean * scale

    # ---- pass 2: conv matmul + fused BN affine, fully parallel grid ----
    out_flat = pl.pallas_call(
        _conv_bn_kernel,
        out_shape=jax.ShapeDtypeStruct((N, Cout, P_pad), x.dtype),
        grid=(N, n_ptiles),
        in_specs=[
            pl.BlockSpec((None, Cin, tp), lambda n, j: (n, 0, j)),
            pl.BlockSpec((Cout, Cin), lambda n, j: (0, 0)),
            pl.BlockSpec((Cout, 1), lambda n, j: (0, 0)),
            pl.BlockSpec((Cout, 1), lambda n, j: (0, 0)),
        ],
        out_specs=pl.BlockSpec((None, Cout, tp), lambda n, j: (n, 0, j)),
        compiler_params=pltpu.CompilerParams(
            dimension_semantics=("parallel", "parallel"),
            vmem_limit_bytes=_VMEM_LIMIT),
    )(x_flat, w_mat, scale, shift)

    # Output is already NCHW; just drop the pixel padding and restore H/W.
    return out_flat[:, :, :P].reshape(N, Cout, Ho, Wo)


def _reference(x, conv_w, gamma, beta):
    """Pure-JAX reference: Conv2d(1x1, stride 2, no bias) + BatchNorm2d (train)."""
    xs = x[:, :, ::2, ::2]
    y = jnp.einsum('nchw,oc->nohw', xs.astype(jnp.float32),
                   conv_w[:, :, 0, 0].astype(jnp.float32))
    mean = jnp.mean(y, axis=(0, 2, 3), keepdims=True)
    var = jnp.mean((y - mean) ** 2, axis=(0, 2, 3), keepdims=True)
    return ((y - mean) * lax.rsqrt(var + BN_EPS) * gamma.reshape(1, -1, 1, 1)
            + beta.reshape(1, -1, 1, 1)).astype(x.dtype)


if __name__ == "__main__":
    key = jax.random.PRNGKey(0)
    k_x, k_w, k_g, k_b = jax.random.split(key, 4)

    # Small shapes consistent with the module's forward.
    N, Cin, H, W = 2, 4, 16, 16
    Cout = 2 * Cin

    x = jax.random.normal(k_x, (N, Cin, H, W), dtype=jnp.float32)
    conv_w = 0.1 * jax.random.normal(k_w, (Cout, Cin, 1, 1), dtype=jnp.float32)
    gamma = 1.0 + 0.1 * jax.random.normal(k_g, (Cout,), dtype=jnp.float32)
    beta = 0.1 * jax.random.normal(k_b, (Cout,), dtype=jnp.float32)

    # Downsample path (Conv1x1 stride-2 + BatchNorm via the Pallas kernels).
    out = shortcut(x, conv_w, gamma, beta)
    jax.block_until_ready(out)
    assert out.shape == (N, Cout, H // 2, W // 2), out.shape

    ref = _reference(x, conv_w, gamma, beta)
    assert jnp.allclose(out, ref, atol=1e-4, rtol=1e-4), float(
        jnp.max(jnp.abs(out - ref)))

    # Identity path (input_channels == output_channels).
    out_id = shortcut(
        x,
        jnp.zeros((Cin, Cin, 1, 1), jnp.float32),
        jnp.ones((Cin,), jnp.float32),
        jnp.zeros((Cin,), jnp.float32),
    )
    jax.block_until_ready(out_id)
    assert out_id.shape == x.shape

    print("KERNEL_OK")
</pallas_src>

<mosaic_0001>
module attributes {stable_mosaic.version = 11 : i64} {
  func.func @_stats_kernel(%arg0: i32, %arg1: i32, %arg2: i32, %arg3: memref<1x4x128xf32, #tpu.memory_space<vmem>>, %arg4: memref<1x4x1xf32, #tpu.memory_space<vmem>>, %arg5: memref<1x4x4xf32, #tpu.memory_space<vmem>>) attributes {dimension_semantics = [#tpu.dimension_semantics<parallel>, #tpu.dimension_semantics<arbitrary>, #tpu.dimension_semantics<arbitrary>], iteration_bounds = array<i64: 1, 2, 1>, scalar_prefetch = 0 : i64, scratch_operands = 0 : i64, tpu.core_type = #tpu.core_type<tc>, window_params = [{transform_indices = @transform_0, window_bounds = array<i64: 1, 4, 128>}, {transform_indices = @transform_1, window_bounds = array<i64: 1, 4, 1>}, {transform_indices = @transform_2, window_bounds = array<i64: 1, 4, 4>}]} {
    %c0_i32 = arith.constant 0 : i32
    %0 = arith.cmpi eq, %arg1, %c0_i32 : i32
    %c0_i32_0 = arith.constant 0 : i32
    %1 = arith.cmpi eq, %arg2, %c0_i32_0 : i32
    %2 = arith.andi %0, %1 : i1
    %3 = arith.extui %2 : i1 to i32
    %c0_i32_1 = arith.constant 0 : i32
    %4 = arith.cmpi ne, %3, %c0_i32_1 : i32
    scf.if %4 {
      %cst_17 = arith.constant 0.000000e+00 : f32
      %22 = vector.broadcast %cst_17 : f32 to vector<4x1xf32>
      %c0_18 = arith.constant 0 : index
      %c0_19 = arith.constant 0 : index
      %c0_20 = arith.constant 0 : index
      %23 = vector.load %arg4[%c0_18, %c0_19, %c0_20] : memref<1x4x1xf32, #tpu.memory_space<vmem>>, vector<1x4x1xf32>
      %24 = vector.shape_cast %23 : vector<1x4x1xf32> to vector<4x1xf32>
      %25 = vector.shape_cast %22 : vector<4x1xf32> to vector<1x4x1xf32>
      tpu.vector_store %arg4[%c0_18, %c0_19, %c0_20], %25 {strides = array<i32>} : memref<1x4x1xf32, #tpu.memory_space<vmem>>, vector<1x4x1xf32>,
      %cst_21 = arith.constant 0.000000e+00 : f32
      %26 = vector.broadcast %cst_21 : f32 to vector<4x4xf32>
      %c0_22 = arith.constant 0 : index
      %c0_23 = arith.constant 0 : index
      %c0_24 = arith.constant 0 : index
      %27 = vector.load %arg5[%c0_22, %c0_23, %c0_24] : memref<1x4x4xf32, #tpu.memory_space<vmem>>, vector<1x4x4xf32>
      %28 = vector.shape_cast %27 : vector<1x4x4xf32> to vector<4x4xf32>
      %29 = vector.shape_cast %26 : vector<4x4xf32> to vector<1x4x4xf32>
      tpu.vector_store %arg5[%c0_22, %c0_23, %c0_24], %29 {strides = array<i32>} : memref<1x4x4xf32, #tpu.memory_space<vmem>>, vector<1x4x4xf32>,
    } else {
    }
    %c0 = arith.constant 0 : index
    %c0_2 = arith.constant 0 : index
    %c0_3 = arith.constant 0 : index
    %5 = vector.load %arg3[%c0, %c0_2, %c0_3] : memref<1x4x128xf32, #tpu.memory_space<vmem>>, vector<1x4x128xf32>
    %6 = vector.shape_cast %5 : vector<1x4x128xf32> to vector<4x128xf32>
    %c0_4 = arith.constant 0 : index
    %c0_5 = arith.constant 0 : index
    %c0_6 = arith.constant 0 : index
    %7 = vector.load %arg4[%c0_4, %c0_5, %c0_6] : memref<1x4x1xf32, #tpu.memory_space<vmem>>, vector<1x4x1xf32>
    %8 = vector.shape_cast %7 : vector<1x4x1xf32> to vector<4x1xf32>
    %cst = arith.constant dense<0.000000e+00> : vector<4xf32>
    %9 = vector.multi_reduction <add>, %6, %cst [1] : vector<4x128xf32> to vector<4xf32>
    %10 = vector.shape_cast %9 : vector<4xf32> to vector<4x1xf32>
    %11 = arith.addf %8, %10 : vector<4x1xf32>
    %c0_7 = arith.constant 0 : index
    %c0_8 = arith.constant 0 : index
    %c0_9 = arith.constant 0 : index
    %12 = vector.load %arg4[%c0_7, %c0_8, %c0_9] : memref<1x4x1xf32, #tpu.memory_space<vmem>>, vector<1x4x1xf32>
    %13 = vector.shape_cast %12 : vector<1x4x1xf32> to vector<4x1xf32>
    %14 = vector.shape_cast %11 : vector<4x1xf32> to vector<1x4x1xf32>
    tpu.vector_store %arg4[%c0_7, %c0_8, %c0_9], %14 {strides = array<i32>} : memref<1x4x1xf32, #tpu.memory_space<vmem>>, vector<1x4x1xf32>,
    %c0_10 = arith.constant 0 : index
    %c0_11 = arith.constant 0 : index
    %c0_12 = arith.constant 0 : index
    %15 = vector.load %arg5[%c0_10, %c0_11, %c0_12] : memref<1x4x4xf32, #tpu.memory_space<vmem>>, vector<1x4x4xf32>
    %16 = vector.shape_cast %15 : vector<1x4x4xf32> to vector<4x4xf32>
    %cst_13 = arith.constant dense<0.000000e+00> : vector<4x4xf32>
    %17 = tpu.matmul %6, %6, %cst_13 {dimension_numbers = #tpu.dot_dimension_numbers<[1], [1], [0], [0], [0, 0, 1, 0], [], []>} : vector<4x128xf32>, vector<4x128xf32>, vector<4x4xf32> -> vector<4x4xf32>
    %18 = arith.addf %16, %17 : vector<4x4xf32>
    %c0_14 = arith.constant 0 : index
    %c0_15 = arith.constant 0 : index
    %c0_16 = arith.constant 0 : index
    %19 = vector.load %arg5[%c0_14, %c0_15, %c0_16] : memref<1x4x4xf32, #tpu.memory_space<vmem>>, vector<1x4x4xf32>
    %20 = vector.shape_cast %19 : vector<1x4x4xf32> to vector<4x4xf32>
    %21 = vector.shape_cast %18 : vector<4x4xf32> to vector<1x4x4xf32>
    tpu.vector_store %arg5[%c0_14, %c0_15, %c0_16], %21 {strides = array<i32>} : memref<1x4x4xf32, #tpu.memory_space<vmem>>, vector<1x4x4xf32>,
    return
  }
  func.func @transform_0(%arg0: i32, %arg1: i32, %arg2: i32) -> (i32, i32, i32) {
    %c1_i32 = arith.constant 1 : i32
    %0 = arith.muli %arg0, %c1_i32 : i32
    %1 = arith.addi %0, %arg2 : i32
    %c0_i32 = arith.constant 0 : i32
    %c0_i32_0 = arith.constant 0 : i32
    return %arg1, %c0_i32, %1 : i32, i32, i32
  }
  func.func @transform_1(%arg0: i32, %arg1: i32, %arg2: i32) -> (i32, i32, i32) {
    %c0_i32 = arith.constant 0 : i32
    %c0_i32_0 = arith.constant 0 : i32
    %c0_i32_1 = arith.constant 0 : i32
    return %arg0, %c0_i32, %c0_i32_0 : i32, i32, i32
  }
  func.func @transform_2(%arg0: i32, %arg1: i32, %arg2: i32) -> (i32, i32, i32) {
    %c0_i32 = arith.constant 0 : i32
    %c0_i32_0 = arith.constant 0 : i32
    %c0_i32_1 = arith.constant 0 : i32
    return %arg0, %c0_i32, %c0_i32_0 : i32, i32, i32
  }
}

</mosaic_0001>

<bundles_post_ra>
// kernel: tpu_custom_call.1
= control target key start
LH: loop header
LB: loop body
LE: loop exit
PB: predicated region body
PF: predicated region fallthrough
CT: control target
= control target key end

     0   :  { %8 = vsyncpa [#allocation3], 0  ;;  %s647_s0 = inlined_call_operand.hbm [shape: f32[2,4,128], index: 0, kind: input, shape index: {}]   ;;  %s648_s1 = inlined_call_operand.vmem [shape: f32[1,4,1], index: 1, kind: output, shape index: {0}]   ;;  %s649_s2 = inlined_call_operand.hbm [shape: f32[1,4,4], index: 2, kind: output, shape index: {1}]  }
   0x1   :  { %10 = vsyncpa [#allocation3 + $0x1], 0 }
   0x2   :  { %11 = vsyncpa [#allocation4], 0  ;;  %s547_s9 = smov 0   ;;  %s549_s10 = smov 0  }
   0x3   :  { %s551_s11 = smov 0   ;;  %s553_s12 = smov 0  }
   0x4   :  { %s555_s13 = smov 0   ;;  %s557_s14 = smov 0  }
   0x5 LB: > { %s339_s15 = sadd.s32 4294967295, %s528_s14   ;;  %s32_s16 = sadd.s32 1, %s524_s13  ;;  %s528_s14 = sphi %s557_s14, %s17_s14   ;;  %s524_s13 = sphi %s555_s13, %s656_s13   ;;  %s520_s12 = sphi %s553_s12, %s655_s12   ;;  %s516_s11 = sphi %s551_s11, %s654_s11   ;;  %s512_s10 = sphi %s549_s10, %s653_s10   ;;  %s508_s9 = sphi %s547_s9, %s652_s9  }
   0x6   : > { %p34_p0 = scmp.ge.s32.totalorder %s32_s16, 2  ;;  %s47_s17 = sadd.s32 1, %s516_s11 }
   0x7   : > { %p54_p1 = scmp.ne.s32.totalorder %s516_s11, %s512_s10  ;;  %p55_p2 = scmp.eq.s32.totalorder %s528_s14, 0 }
   0x8   : > { %s658_s16 = smov (%p34_p0, %s32_s16), 0  ;;  %p60_p4 = scmp.ne.s32.totalorder %s512_s10, %s508_s9 }
   0x9   : > { %p583_p3 = por %p55_p2, %p54_p1  ;;  %s42_s19 = ssub.s32 %s524_s13, %s658_s16 }
   0xa   : > { %p61_p5 = scmp.eq.s32.totalorder %s339_s15, 0  ;;  %p45_p6 = scmp.eq.s32.totalorder %s42_s19, 0 }
   0xb   : > { %p363_p8 = scmp.lt.s32.totalorder %s528_s14, 2  ;;  %s136_s22 = sand.u32 1, %s516_s11  }
   0xc   : > { %p592_p7 = por %p61_p5, %p60_p4  ;;  %s343_s23 = sshll.u32 %s524_s13, 2 }
   0xd   : > { %s598_s21 = scalar_select %p45_p6, %s516_s11, %s47_s17  }
   0xe   : > { %s342_s24 = sshll.u32 %s136_s22, 2  ;;  %s146_s27 = scalar_lea.hbm %s647_s0, %s343_s23 }
   0xf   : > { %s148_s28 = sshll.u32 %s146_s27, 4  ;;  %s140_s29 = scalar_lea.vmem [#allocation2], %s342_s24  ;;  %s149_s28 = int_to_ptr.hbm [resolvable:$true] %s148_s28 }
  0x10   : > { %s150_s30 = sshll.u32 %s140_s29, 4  ;;  %p360_p9 = pnand %p363_p8, %p583_p3  ;;  %s151_s30 = int_to_ptr.vmem [resolvable:$true] %s150_s30 }
  0x11   : > { %p344_p10 = scmp.ge.s32.totalorder %s528_s14, 1  ;;  %p155_p11 = scmp.lt.s32.totalorder %s528_s14, 3 }
  0x12   : > { %s137_s3 = scalar_lea.sflag [#allocation3], %s136_s22 }
  0x13   : > { %362 = dma.hbm_to_vmem [thread:$0]  (!%p360_p9), %s149_s28, 64, %s151_s30, %s137_s3  }
  0x14   : > { %p156_p12 = pnand %p344_p10, %p155_p11 }
  0x15   : > { %s161_s4 = sand.u32 (!%p156_p12), 1, %s512_s10  }
  0x16   : > { %159 = sbr.rel (%p156_p12) target bundleno = 171 (0xab), region = 24  ;;  %s345_s5 = sshll.u32 (!%p156_p12), %s161_s4, 2 }
  0x17   : > { %s162_s6 = scalar_lea.sflag (!%p156_p12), [#allocation3], %s161_s4  ;;  %s165_s7 = scalar_lea.vmem (!%p156_p12), [#allocation2], %s345_s5 }
  0x1b   : > { %499 = dma.done.wait (%p592_p7), %s162_s6, 64  }
  0x1c   : > { %501 = vsyncadd (%p592_p7), %s162_s6, 4294967232  ;;  %p191_p13 = scmp.eq.s32.totalorder %s520_s12, 0 }
  0x1d   : > { %vm197_vm0 = vcmask (%p191_p13), 3072   ;;  %vm199_vm1 = vcmask (%p191_p13), 27648   ;;  %v530_v0 = vmov (%p191_p13), 0.0  }
  0x1e   : > { %196 = sbr.rel (!%p191_p13) target bundleno = 35 (0x23), region = 32  ;;  %198 = vst.msk [vmem:[%s648_s1] sm:$0xf] (%p191_p13), %vm197_vm0, %v530_v0 }
  0x1f   : > { %200 = vst.msk [vmem:[#allocation5] sm:$0xf] (%p191_p13), %vm199_vm1, %v530_v0 }
  0x23 PF: > { %v201_v1 = vld [vmem:[%s165_s7] sm:$0xf]  ;;  %vm203_vm2 = vcmask 1043456   ;;  %vm208_vm3 = vcmask 3072   ;;  %s531_s20 = smov [#allocation5]   ;;  %s251_s25 = sshll.u32 %s649_s2, 4  ;;  %s252_s25 = int_to_ptr.hbm [resolvable:$true] %s251_s25 }
  0x24   : > { %226 = vmatpush.xpose.msra.mxu0 %v201_v1  ;;  %v204_v2 = vsel %vm203_vm2, %v201_v1, 0.0  ;;  %s249_s22 = sshll.u32 %s531_s20, 4  ;;  %vm232_vm4 = vcmask 27648   ;;  %p364_p0 = scmp.eq.s32.totalorder %s339_s15, 1  ;;  %s250_s22 = int_to_ptr.vmem [resolvable:$true] %s249_s22 }
  0x25   : > { %205 = vadd.xlane.f32.xlu0 %v204_v2  ;;  %v202_v3 = vld [vmem:[%s648_s1] sm:$0xf] }
  0x26   : > { %v210_v6 = vld [vmem:[#allocation5] sm:$0xf] }
  0x27   : > { %227 = vmatmul.f32.vlgmr.msra.gmra.mxu0 %v201_v1 }
  0x98   : > { %v206_v4 = vpop.xlane.xlu0 %205 }
  0x99   : > { %v207_v5 = vadd.f32 %v206_v4, %v202_v3 }
  0x9b   : > { %209 = vst.msk [vmem:[%s648_s1] sm:$0xf] %vm208_vm3, %v207_v5 }
  0xa4   : > { %v228_v7 = vpop.f32.mrf.mxu0 }
  0xa5   : > { %v231_v8 = vadd.f32 %v228_v7, %v210_v6 }
  0xa7   : > { %233 = vst.msk [vmem:[#allocation5] sm:$0xf] %vm232_vm4, %v231_v8 }
  0xa8   : > { %356 = dma.vmem_to_hbm [thread:$0]  (%p364_p0), %s250_s22, 64, %s252_s25, [#allocation4]  }
  0xa9   : > { %503 = dma.done.wait (%p364_p0), [#allocation4], 64  }
  0xaa   : > { %505 = vsyncadd (%p364_p0), [#allocation4], 4294967232 }
  0xab PF: > { %s17_s14 = sadd.s32 1, %s528_s14   ;;  %s652_s9 = smov %s512_s10 }
  0xac   : > { %p14_p1 = scmp.ge.s32.totalorder %s17_s14, 4   ;;  %s653_s10 = smov %s516_s11 }
  0xad   : > { %s654_s11 = smov %s598_s21  ;;  %s655_s12 = smov %s524_s13 }
  0xae   : > { %s656_s13 = smov %s658_s16  ;;  %16 = sbr.rel (!%p14_p1) target bundleno = 5 (0x5), region = 78 }
  0xb3   :  { %272 = vsyncpa [#allocation3], 1 }
  0xb4   :  { %274 = vsyncpa [#allocation3 + $0x1], 1 }
  0xb5   :  { %275 = vsyncpa [#allocation4], 1 }
  0xb6   :  { %277 = vsyncpa [#allocation4 + $0x1], 1 }

</bundles_post_ra>
